<compile_context>
chip_gen: v5e
topology: v5e:2x2
jax: 0.10.0
libtpu: 0.0.40
codegen_flags: <defaults>
</compile_context>

<pallas_src>
from functools import partial

import jax
import jax.numpy as jnp
from jax.experimental import pallas as pl
from jax.experimental.pallas import tpu as pltpu

LANE = 128  # TPU lane width; pad hidden/action feature dims up to this.


def _round_up(n, m):
    return ((n + m - 1) // m) * m


def qnet_kernel(x_ref, w1_ref, b1_ref, w2_ref, b2_ref, w3_ref, b3_ref, o_ref):
    # Fused 3-layer MLP on one batch tile. Biases are [1, N]; the implicit
    # broadcast happens once per tile (no per-iteration re-broadcast).
    x = x_ref[...]
    h1 = jnp.dot(x, w1_ref[...], preferred_element_type=jnp.float32) + b1_ref[...]
    h1 = jnp.maximum(h1, 0.0)
    h2 = jnp.dot(h1, w2_ref[...], preferred_element_type=jnp.float32) + b2_ref[...]
    h2 = jnp.maximum(h2, 0.0)
    q = jnp.dot(h2, w3_ref[...], preferred_element_type=jnp.float32) + b3_ref[...]
    o_ref[...] = q.astype(o_ref.dtype)


def prepare_params(params):
    """One-time glue (do NOT call per forward): transpose PyTorch-layout weights
    [out, in] -> [in, out] and zero-pad hidden / action dims up to 128 lanes.
    Biases become [1, N_padded]."""
    hidden_size, state_dim = params["w1"].shape
    action_dim = params["w3"].shape[0]
    H = _round_up(hidden_size, LANE)
    A = _round_up(action_dim, LANE)

    def pad2(w, rows, cols):
        out = jnp.zeros((rows, cols), jnp.float32)
        return out.at[: w.shape[0], : w.shape[1]].set(w.astype(jnp.float32))

    return {
        "w1": pad2(params["w1"].T, state_dim, H),
        "b1": pad2(params["b1"][None, :], 1, H),
        "w2": pad2(params["w2"].T, H, H),
        "b2": pad2(params["b2"][None, :], 1, H),
        "w3": pad2(params["w3"].T, H, A),
        "b3": pad2(params["b3"][None, :], 1, A),
        "action_dim": action_dim,
    }


@partial(jax.jit, static_argnames=("action_dim",))
def _qnet_forward_jit(x, w1, b1, w2, b2, w3, b3, *, action_dim):
    B, S = x.shape
    H = w1.shape[1]
    A = w3.shape[1]

    # Batch tile: large enough to amortize the ~0.35us per-grid-step overhead,
    # multiple of 8 (f32 sublanes), capped so tiny batches use a single small tile.
    TB = min(1024, _round_up(B, 8))
    grid = (pl.cdiv(B, TB),)

    resident = lambda shape: pl.BlockSpec(shape, lambda i: (0, 0))  # VMEM-resident

    flops = 2 * B * (S * H + H * H + H * A)
    bytes_accessed = 4 * (B * S + S * H + H * H + H * A + 2 * H + A + B * A)

    q_pad = pl.pallas_call(
        qnet_kernel,
        out_shape=jax.ShapeDtypeStruct((B, A), jnp.float32),
        grid=grid,
        in_specs=[
            pl.BlockSpec((TB, S), lambda i: (i, 0)),   # streamed batch tile
            resident(w1.shape), resident(b1.shape),
            resident(w2.shape), resident(b2.shape),
            resident(w3.shape), resident(b3.shape),
        ],
        out_specs=pl.BlockSpec((TB, A), lambda i: (i, 0)),  # lane-dense (128-wide) store
        compiler_params=pltpu.CompilerParams(
            dimension_semantics=("parallel",),   # dual-TC sharding on v7x
            vmem_limit_bytes=32 << 20,           # conservative: safe on v7x's 64 MiB
        ),
        cost_estimate=pl.CostEstimate(
            flops=flops, transcendentals=0, bytes_accessed=bytes_accessed),
    )(x, w1, b1, w2, b2, w3, b3)

    return q_pad[:, :action_dim]


def qnetwork_forward(x, prepared):
    """x: [B, state_dim] float32. prepared: output of prepare_params."""
    return _qnet_forward_jit(
        x,
        prepared["w1"], prepared["b1"],
        prepared["w2"], prepared["b2"],
        prepared["w3"], prepared["b3"],
        action_dim=prepared["action_dim"],
    )


def init_params(key, state_dim, action_dim, hidden_size):
    """Deterministic kaiming_normal_(mode='fan_in', nonlinearity='relu'), zero biases.
    Weights in PyTorch layout [out_features, in_features]."""
    def kaiming(k, out_f, in_f):
        std = (2.0 / in_f) ** 0.5  # gain(relu)=sqrt(2), fan_in mode
        return std * jax.random.normal(k, (out_f, in_f), dtype=jnp.float32)

    k1, k2, k3 = jax.random.split(key, 3)
    return {
        "w1": kaiming(k1, hidden_size, state_dim),
        "b1": jnp.zeros((hidden_size,), jnp.float32),
        "w2": kaiming(k2, hidden_size, hidden_size),
        "b2": jnp.zeros((hidden_size,), jnp.float32),
        "w3": kaiming(k3, action_dim, hidden_size),
        "b3": jnp.zeros((action_dim,), jnp.float32),
    }


def reference_forward(x, params):
    """Pure-JAX reference replicating the PyTorch forward exactly."""
    h1 = jnp.maximum(x @ params["w1"].T + params["b1"], 0.0)
    h2 = jnp.maximum(h1 @ params["w2"].T + params["b2"], 0.0)
    return h2 @ params["w3"].T + params["b3"]


if __name__ == "__main__":
    # Small shapes consistent with the int-state_dim branch of QNetwork.
    batch, state_dim, action_dim, hidden_size = 2, 16, 8, 64

    key = jax.random.PRNGKey(0)
    k_params, k_x = jax.random.split(key)
    params = init_params(k_params, state_dim, action_dim, hidden_size)
    x = jax.random.normal(k_x, (batch, state_dim), dtype=jnp.float32)

    prepared = prepare_params(params)        # one-time transpose + 128-lane padding
    q = qnetwork_forward(x, prepared)
    q = jax.block_until_ready(q)

    q_ref = reference_forward(x, params)
    assert q.shape == (batch, action_dim)
    assert jnp.allclose(q, q_ref, atol=1e-5, rtol=1e-5), "mismatch vs reference"

    # TODO(synk): the Conv2d branch (tuple state_dim) of QNetwork is not implemented
    # here; only the int-state_dim MLP path is covered by this kernel.
    print("KERNEL_OK")
</pallas_src>

<mosaic_0001>
module attributes {stable_mosaic.version = 11 : i64} {
  func.func @qnet_kernel(%arg0: i32, %arg1: memref<8x16xf32, #tpu.memory_space<vmem>>, %arg2: memref<16x128xf32, #tpu.memory_space<vmem>>, %arg3: memref<1x128xf32, #tpu.memory_space<vmem>>, %arg4: memref<128x128xf32, #tpu.memory_space<vmem>>, %arg5: memref<1x128xf32, #tpu.memory_space<vmem>>, %arg6: memref<128x128xf32, #tpu.memory_space<vmem>>, %arg7: memref<1x128xf32, #tpu.memory_space<vmem>>, %arg8: memref<8x128xf32, #tpu.memory_space<vmem>>) attributes {dimension_semantics = [#tpu.dimension_semantics<parallel>], iteration_bounds = array<i64: 1>, scalar_prefetch = 0 : i64, scratch_operands = 0 : i64, tpu.core_type = #tpu.core_type<tc>, window_params = [{transform_indices = @transform_0, window_bounds = array<i64: 8, 16>}, {pipeline_mode = #tpu.pipeline_mode<synchronous>, transform_indices = @transform_1, window_bounds = array<i64: 16, 128>}, {pipeline_mode = #tpu.pipeline_mode<synchronous>, transform_indices = @transform_2, window_bounds = array<i64: 1, 128>}, {pipeline_mode = #tpu.pipeline_mode<synchronous>, transform_indices = @transform_3, window_bounds = array<i64: 128, 128>}, {pipeline_mode = #tpu.pipeline_mode<synchronous>, transform_indices = @transform_4, window_bounds = array<i64: 1, 128>}, {pipeline_mode = #tpu.pipeline_mode<synchronous>, transform_indices = @transform_5, window_bounds = array<i64: 128, 128>}, {pipeline_mode = #tpu.pipeline_mode<synchronous>, transform_indices = @transform_6, window_bounds = array<i64: 1, 128>}, {transform_indices = @transform_7, window_bounds = array<i64: 8, 128>}]} {
    %c0 = arith.constant 0 : index
    %c0_0 = arith.constant 0 : index
    %0 = vector.load %arg1[%c0, %c0_0] : memref<8x16xf32, #tpu.memory_space<vmem>>, vector<8x16xf32>
    %c0_1 = arith.constant 0 : index
    %c0_2 = arith.constant 0 : index
    %1 = vector.load %arg2[%c0_1, %c0_2] : memref<16x128xf32, #tpu.memory_space<vmem>>, vector<16x128xf32>
    %cst = arith.constant dense<0.000000e+00> : vector<8x128xf32>
    %2 = tpu.matmul %0, %1, %cst {dimension_numbers = #tpu.dot_dimension_numbers<[1], [0], [0], [1], [0, 0, 1, 1], [], []>} : vector<8x16xf32>, vector<16x128xf32>, vector<8x128xf32> -> vector<8x128xf32>
    %c0_3 = arith.constant 0 : index
    %c0_4 = arith.constant 0 : index
    %3 = vector.load %arg3[%c0_3, %c0_4] : memref<1x128xf32, #tpu.memory_space<vmem>>, vector<1x128xf32>
    %4 = vector.broadcast %3 : vector<1x128xf32> to vector<8x128xf32>
    %5 = arith.addf %2, %4 : vector<8x128xf32>
    %cst_5 = arith.constant 0.000000e+00 : f32
    %6 = vector.broadcast %cst_5 : f32 to vector<8x128xf32>
    %7 = arith.maximumf %5, %6 : vector<8x128xf32>
    %c0_6 = arith.constant 0 : index
    %c0_7 = arith.constant 0 : index
    %8 = vector.load %arg4[%c0_6, %c0_7] : memref<128x128xf32, #tpu.memory_space<vmem>>, vector<128x128xf32>
    %cst_8 = arith.constant dense<0.000000e+00> : vector<8x128xf32>
    %9 = tpu.matmul %7, %8, %cst_8 {dimension_numbers = #tpu.dot_dimension_numbers<[1], [0], [0], [1], [0, 0, 1, 1], [], []>} : vector<8x128xf32>, vector<128x128xf32>, vector<8x128xf32> -> vector<8x128xf32>
    %c0_9 = arith.constant 0 : index
    %c0_10 = arith.constant 0 : index
    %10 = vector.load %arg5[%c0_9, %c0_10] : memref<1x128xf32, #tpu.memory_space<vmem>>, vector<1x128xf32>
    %11 = vector.broadcast %10 : vector<1x128xf32> to vector<8x128xf32>
    %12 = arith.addf %9, %11 : vector<8x128xf32>
    %cst_11 = arith.constant 0.000000e+00 : f32
    %13 = vector.broadcast %cst_11 : f32 to vector<8x128xf32>
    %14 = arith.maximumf %12, %13 : vector<8x128xf32>
    %c0_12 = arith.constant 0 : index
    %c0_13 = arith.constant 0 : index
    %15 = vector.load %arg6[%c0_12, %c0_13] : memref<128x128xf32, #tpu.memory_space<vmem>>, vector<128x128xf32>
    %cst_14 = arith.constant dense<0.000000e+00> : vector<8x128xf32>
    %16 = tpu.matmul %14, %15, %cst_14 {dimension_numbers = #tpu.dot_dimension_numbers<[1], [0], [0], [1], [0, 0, 1, 1], [], []>} : vector<8x128xf32>, vector<128x128xf32>, vector<8x128xf32> -> vector<8x128xf32>
    %c0_15 = arith.constant 0 : index
    %c0_16 = arith.constant 0 : index
    %17 = vector.load %arg7[%c0_15, %c0_16] : memref<1x128xf32, #tpu.memory_space<vmem>>, vector<1x128xf32>
    %18 = vector.broadcast %17 : vector<1x128xf32> to vector<8x128xf32>
    %19 = arith.addf %16, %18 : vector<8x128xf32>
    %c0_17 = arith.constant 0 : index
    %c0_18 = arith.constant 0 : index
    %20 = vector.load %arg8[%c0_17, %c0_18] : memref<8x128xf32, #tpu.memory_space<vmem>>, vector<8x128xf32>
    tpu.vector_store %arg8[%c0_17, %c0_18], %19 {strides = array<i32>} : memref<8x128xf32, #tpu.memory_space<vmem>>, vector<8x128xf32>,
    return
  }
  func.func @transform_0(%arg0: i32) -> (i32, i32) {
    %c0_i32 = arith.constant 0 : i32
    %c0_i32_0 = arith.constant 0 : i32
    return %arg0, %c0_i32 : i32, i32
  }
  func.func @transform_1(%arg0: i32) -> (i32, i32) {
    %c0_i32 = arith.constant 0 : i32
    %c0_i32_0 = arith.constant 0 : i32
    %c0_i32_1 = arith.constant 0 : i32
    return %c0_i32, %c0_i32_0 : i32, i32
  }
  func.func @transform_2(%arg0: i32) -> (i32, i32) {
    %c0_i32 = arith.constant 0 : i32
    %c0_i32_0 = arith.constant 0 : i32
    %c0_i32_1 = arith.constant 0 : i32
    return %c0_i32, %c0_i32_0 : i32, i32
  }
  func.func @transform_3(%arg0: i32) -> (i32, i32) {
    %c0_i32 = arith.constant 0 : i32
    %c0_i32_0 = arith.constant 0 : i32
    %c0_i32_1 = arith.constant 0 : i32
    return %c0_i32, %c0_i32_0 : i32, i32
  }
  func.func @transform_4(%arg0: i32) -> (i32, i32) {
    %c0_i32 = arith.constant 0 : i32
    %c0_i32_0 = arith.constant 0 : i32
    %c0_i32_1 = arith.constant 0 : i32
    return %c0_i32, %c0_i32_0 : i32, i32
  }
  func.func @transform_5(%arg0: i32) -> (i32, i32) {
    %c0_i32 = arith.constant 0 : i32
    %c0_i32_0 = arith.constant 0 : i32
    %c0_i32_1 = arith.constant 0 : i32
    return %c0_i32, %c0_i32_0 : i32, i32
  }
  func.func @transform_6(%arg0: i32) -> (i32, i32) {
    %c0_i32 = arith.constant 0 : i32
    %c0_i32_0 = arith.constant 0 : i32
    %c0_i32_1 = arith.constant 0 : i32
    return %c0_i32, %c0_i32_0 : i32, i32
  }
  func.func @transform_7(%arg0: i32) -> (i32, i32) {
    %c0_i32 = arith.constant 0 : i32
    %c0_i32_0 = arith.constant 0 : i32
    return %arg0, %c0_i32 : i32, i32
  }
}

</mosaic_0001>

<bundles_post_ra>
// kernel: _qnet_forward_jit.1
= control target key start
LH: loop header
LB: loop body
LE: loop exit
PB: predicated region body
PF: predicated region fallthrough
CT: control target
= control target key end

     0   :  { %12 = vsyncpa [#allocation3], 0  ;;  %s445_s0 = inlined_call_operand.hbm [shape: f32[2,16], index: 0, kind: input, shape index: {}]   ;;  %s446_s1 = inlined_call_operand.hbm [shape: f32[16,128], index: 1, kind: input, shape index: {}]   ;;  %s447_s2 = inlined_call_operand.vmem [shape: f32[1,128], index: 2, kind: input, shape index: {}]   ;;  %s448_s3 = inlined_call_operand.hbm [shape: f32[128,128], index: 3, kind: input, shape index: {}]   ;;  %s449_s4 = inlined_call_operand.vmem [shape: f32[1,128], index: 4, kind: input, shape index: {}]   ;;  %s450_s5 = inlined_call_operand.hbm [shape: f32[128,128], index: 5, kind: input, shape index: {}]   ;;  %s451_s6 = inlined_call_operand.vmem [shape: f32[1,128], index: 6, kind: input, shape index: {}]   ;;  %s452_s7 = inlined_call_operand.hbm [shape: f32[2,128], index: 7, kind: output, shape index: {}]  }
   0x1   :  { %13 = vsyncpa [#allocation6], 0 }
   0x2   :  { %14 = vsyncpa [#allocation9], 0 }
   0x3   :  { %15 = vsyncpa [#allocation4], 0  ;;  %s33_s26 = sshll.u32 %s446_s1, 4  ;;  %s34_s26 = int_to_ptr.hbm [resolvable:$true] %s33_s26 }
   0x4   :  { %19 = vsyncadd [#allocation3], 96  ;;  %s366_s27 = smov [#allocation5]   ;;  %s20_s8 = sshll.u32 %s445_s0, 4  ;;  %s21_s8 = int_to_ptr.hbm [resolvable:$true] %s20_s8 }
   0x5   :  { %s35_s28 = sshll.u32 %s366_s27, 4  ;;  %s367_s9 = smov 128   ;;  %s36_s28 = int_to_ptr.vmem [resolvable:$true] %s35_s28 }
   0x6   :  { %s368_s10 = smov 8   ;;  %s369_s11 = smov [#allocation2]  }
   0x7   :  { %41 = dma.hbm_to_vmem [thread:$0]  %s34_s26, 256, %s36_s28, [#allocation6], %s367_s9, %s367_s9, %s368_s10  }
   0x8   :  { %s22_s12 = sshll.u32 %s369_s11, 4  ;;  %s370_s13 = smov 32   ;;  %s23_s12 = int_to_ptr.vmem [resolvable:$true] %s22_s12 }
   0x9   :  { %s371_s14 = smov 2   ;;  %s48_s16 = sshll.u32 %s448_s3, 4  ;;  %s49_s16 = int_to_ptr.hbm [resolvable:$true] %s48_s16 }
   0xa   :  { %28 = dma.hbm_to_vmem [thread:$0]  %s21_s8, 32, %s23_s12, [#allocation3], %s370_s13, %s370_s13, %s371_s14  }
   0xb   :  { %s372_s17 = smov [#allocation7]   ;;  %s63_s20 = sshll.u32 %s450_s5, 4  ;;  %s64_s20 = int_to_ptr.hbm [resolvable:$true] %s63_s20 }
   0xc   :  { %s50_s0 = sshll.u32 %s372_s17, 4  ;;  %s373_s21 = smov [#allocation8]   ;;  %s51_s0 = int_to_ptr.vmem [resolvable:$true] %s50_s0 }
   0xd   :  { %56 = dma.hbm_to_vmem [thread:$0]  %s49_s16, 2048, %s51_s0, [#allocation6], %s367_s9, %s367_s9, %s368_s10  }
   0xe   :  { %s65_s22 = sshll.u32 %s373_s21, 4  ;;  %s66_s22 = int_to_ptr.vmem [resolvable:$true] %s65_s22 }
   0xf   :  { %71 = dma.hbm_to_vmem [thread:$0]  %s64_s20, 2048, %s66_s22, [#allocation9], %s367_s9, %s367_s9, %s368_s10  }
  0x10   :  { %358 = dma.done.wait [#allocation3], 128  }
  0x11   :  { %359 = vsyncadd [#allocation3], 4294967168 }
  0x12   :  { %360 = dma.done.wait [#allocation6], 2304  }
  0x13   :  { %361 = vsyncadd [#allocation6], 4294964992 }
  0x14   :  { %362 = dma.done.wait [#allocation9], 2048  }
  0x15   :  { %363 = vsyncadd [#allocation9], 4294965248  ;;  %v92_v0 = vld [vmem:[#allocation5 + $0x8] sm:$0xff]  ;;  %v91_v1 = vld [vmem:[#allocation5] sm:$0xff]  ;;  %vm97_vm0 = vcmask 130048  }
  0x16   :  { %115 = vmatpush.msra.mxu0 %v92_v0  ;;  %v90_v2 = vld [vmem:[#allocation2] sm:$0xff]  ;;  %v137_v3 = vld [vmem:[#allocation7 + $0x78] sm:$0xff]  ;;  %v136_v4 = vld [vmem:[#allocation7 + $0x70] sm:$0xff] }
  0x17   :  { %142 = vmatpush.msra.mxu1 %v137_v3  ;;  %v135_v5 = vld [vmem:[#allocation7 + $0x68] sm:$0xff]  ;;  %v134_v6 = vld [vmem:[#allocation7 + $0x60] sm:$0xff]  ;;  %v133_v7 = vld [vmem:[#allocation7 + $0x58] sm:$0xff] }
  0x18   :  { %116 = vmatpush.msra.mxu0 %v91_v1  ;;  %v132_v8 = vld [vmem:[#allocation7 + $0x50] sm:$0xff]  ;;  %v131_v9 = vld [vmem:[#allocation7 + $0x48] sm:$0xff]  ;;  %v130_v10 = vld [vmem:[#allocation7 + $0x40] sm:$0xff] }
  0x19   :  { %225 = vmatmul.msk.f32.vlgmr.msra.gmra.mxu0 %vm97_vm0, %v90_v2  ;;  %143 = vmatpush.msra.mxu1 %v136_v4  ;;  %v129_v11 = vld [vmem:[#allocation7 + $0x38] sm:$0xff]  ;;  %v128_v12 = vld [vmem:[#allocation7 + $0x30] sm:$0xff]  ;;  %v127_v13 = vld [vmem:[#allocation7 + $0x28] sm:$0xff] }
  0x1a   :  { %v126_v14 = vld [vmem:[#allocation7 + $0x20] sm:$0xff]  ;;  %v125_v15 = vld [vmem:[#allocation7 + $0x18] sm:$0xff]  ;;  %v124_v16 = vld [vmem:[#allocation7 + $0x10] sm:$0xff] }
  0x1b   :  { %144 = vmatpush.msra.mxu1 %v135_v5  ;;  %v123_v17 = vld [vmem:[#allocation7 + $0x8] sm:$0xff]  ;;  %v122_v18 = vld [vmem:[#allocation7] sm:$0xff]  ;;  %v178_v19 = vld [vmem:[#allocation8 + $0x78] sm:$0xff] }
  0x1c   :  { %v177_v20 = vld [vmem:[#allocation8 + $0x70] sm:$0xff]  ;;  %183 = vmatpush.msra.mxu2 %v178_v19  ;;  %v176_v21 = vld [vmem:[#allocation8 + $0x68] sm:$0xff]  ;;  %v175_v22 = vld [vmem:[#allocation8 + $0x60] sm:$0xff] }
  0x1d   :  { %145 = vmatpush.msra.mxu1 %v134_v6  ;;  %v174_v23 = vld [vmem:[#allocation8 + $0x58] sm:$0xff]  ;;  %v173_v24 = vld [vmem:[#allocation8 + $0x50] sm:$0xff]  ;;  %v172_v25 = vld [vmem:[#allocation8 + $0x48] sm:$0xff] }
  0x1e   :  { %184 = vmatpush.msra.mxu2 %v177_v20  ;;  %v171_v26 = vld [vmem:[#allocation8 + $0x40] sm:$0xff]  ;;  %v170_v27 = vld [vmem:[#allocation8 + $0x38] sm:$0xff]  ;;  %v169_v28 = vld [vmem:[#allocation8 + $0x30] sm:$0xff] }
  0x1f   :  { %146 = vmatpush.msra.mxu1 %v133_v7  ;;  %v168_v29 = vld [vmem:[#allocation8 + $0x28] sm:$0xff]  ;;  %v167_v30 = vld [vmem:[#allocation8 + $0x20] sm:$0xff]  ;;  %v166_v31 = vld [vmem:[#allocation8 + $0x18] sm:$0xff] }
  0x20   :  { %185 = vmatpush.msra.mxu2 %v176_v21  ;;  %v235_v32 = vld [vmem:[%s447_s2] ss:$0 sm:$0xff]  ;;  %v165_v36 = vld [vmem:[#allocation8 + $0x10] sm:$0xff]  ;;  %v163_v38 = vld [vmem:[#allocation8] sm:$0xff] }
  0x21   :  { %147 = vmatpush.msra.mxu1 %v132_v8  ;;  %v164_v37 = vld [vmem:[#allocation8 + $0x8] sm:$0xff] }
  0x22   :  { %186 = vmatpush.msra.mxu2 %v175_v22  ;;  %v236_v39 = vld [vmem:[%s449_s4] ss:$0 sm:$0xff] }
  0x23   :  { %148 = vmatpush.msra.mxu1 %v131_v9  ;;  %v237_v43 = vld [vmem:[%s451_s6] ss:$0 sm:$0xff] }
  0x24   :  { %187 = vmatpush.msra.mxu2 %v174_v23 }
  0x25   :  { %149 = vmatpush.msra.mxu1 %v130_v10 }
  0x26   :  { %188 = vmatpush.msra.mxu2 %v173_v24 }
  0x27   :  { %150 = vmatpush.msra.mxu1 %v129_v11 }
  0x28   :  { %189 = vmatpush.msra.mxu2 %v172_v25 }
  0x29   :  { %151 = vmatpush.msra.mxu1 %v128_v12 }
  0x2a   :  { %190 = vmatpush.msra.mxu2 %v171_v26 }
  0x2b   :  { %152 = vmatpush.msra.mxu1 %v127_v13 }
  0x2c   :  { %191 = vmatpush.msra.mxu2 %v170_v27 }
  0x2d   :  { %153 = vmatpush.msra.mxu1 %v126_v14 }
  0x2e   :  { %192 = vmatpush.msra.mxu2 %v169_v28 }
  0x2f   :  { %154 = vmatpush.msra.mxu1 %v125_v15 }
  0x30   :  { %193 = vmatpush.msra.mxu2 %v168_v29 }
  0x31   :  { %155 = vmatpush.msra.mxu1 %v124_v16 }
  0x32   :  { %194 = vmatpush.msra.mxu2 %v167_v30 }
  0x33   :  { %156 = vmatpush.msra.mxu1 %v123_v17 }
  0x34   :  { %195 = vmatpush.msra.mxu2 %v166_v31 }
  0x35   :  { %157 = vmatpush.msra.mxu1 %v122_v18 }
  0x36   :  { %196 = vmatpush.msra.mxu2 %v165_v36 }
  0x38   :  { %197 = vmatpush.msra.mxu2 %v164_v37 }
  0x3a   :  { %198 = vmatpush.msra.mxu2 %v163_v38 }
  0x96   :  { %v118_v33 = vpop.f32.mrf.mxu0 }
  0x97   :  { %v119_v34 = vadd.f32 %v235_v32, %v118_v33 }
  0x99   :  { %v121_v35 = vmax.f32 %v119_v34, 0.0 }
  0x9b   :  { %158 = vmatmul.f32.vlgmr.msra.gmra.mxu1 %v121_v35 }
 0x118   :  { %v159_v40 = vpop.f32.mrf.mxu1 }
 0x119   :  { %v160_v41 = vadd.f32 %v236_v39, %v159_v40 }
 0x11b   :  { %v162_v42 = vmax.f32 %v160_v41, 0.0 }
 0x11d   :  { %199 = vmatmul.f32.vlgmr.msra.gmra.mxu2 %v162_v42 }
 0x1a0   :  { %v200_v44 = vpop.f32.mrf.mxu2 }
 0x1a1   :  { %v201_v45 = vadd.f32 %v237_v43, %v200_v44 }
 0x1a3   :  { %203 = vst [vmem:[#allocation10] sm:$0xff] %v201_v45 }
 0x1a4   :  { %207 = vsyncadd [#allocation4], 96  ;;  %s210_s28 = sshll.u32 %s452_s7, 4  ;;  %s374_s29 = smov [#allocation10]   ;;  %s211_s28 = int_to_ptr.hbm [resolvable:$true] %s210_s28 }
 0x1a5   :  { %s208_s30 = sshll.u32 %s374_s29, 4  ;;  %s209_s30 = int_to_ptr.vmem [resolvable:$true] %s208_s30 }
 0x1a6   :  { %216 = dma.vmem_to_hbm [thread:$0]  %s209_s30, 32, %s211_s28, [#allocation4], %s370_s13, %s370_s13, %s371_s14  }
 0x1a7   :  { %364 = dma.done.wait [#allocation4], 128  }
 0x1a8   :  { %365 = vsyncadd [#allocation4], 4294967168 }
 0x1a9   :  { %221 = vsyncpa [#allocation3], 1 }
 0x1aa   :  { %222 = vsyncpa [#allocation6], 1 }
 0x1ab   :  { %223 = vsyncpa [#allocation9], 1 }
 0x1ac   :  { %224 = vsyncpa [#allocation4], 1 }

</bundles_post_ra>
